<compile_context>
chip_gen: v7x
topology: tpu7x:2x2x1
jax: 0.10.0
libtpu: 0.0.40
codegen_flags: <defaults>
</compile_context>

<pallas_src>
import functools

import jax
import jax.numpy as jnp
from jax.experimental import pallas as pl
from jax.experimental.pallas import tpu as pltpu

LANE = 128       # lane width (last-dim alignment)
ROW_ALIGN = 16   # row alignment for batch tiles (bf16 sublane pack; also fine for f32)


def _round_up(n, m):
    return (n + m - 1) // m * m


def _mlp_kernel(x_ref, w1_ref, b1_ref, w2_ref, b2_ref, o_ref):
    # fc1: (TB, IN) @ (IN, H_PAD) on the MXU in bf16, f32 accumulate; bias + ReLU in f32.
    x = x_ref[...].astype(w1_ref.dtype)
    h = jnp.dot(x, w1_ref[...], preferred_element_type=jnp.float32)
    h = jnp.maximum(h + b1_ref[...], 0.0)
    # fc2: (TB, H_PAD) @ (H_PAD, O_PAD) — compute stays 128-lane wide in VMEM.
    o = jnp.dot(h.astype(w2_ref.dtype), w2_ref[...], preferred_element_type=jnp.float32)
    o = o + b2_ref[...]
    # sigmoid(o) = 1 / (1 + exp(-o)); exp and reciprocal both go to the EUP slot.
    sig = pl.reciprocal(1.0 + jnp.exp(-o), approx=True)
    # Narrow writeback: store only the true output columns (padded lanes never hit HBM).
    o_ref[...] = sig[:, : o_ref.shape[1]].astype(o_ref.dtype)


def prepare_params(w1, b1, w2, b2, compute_dtype=jnp.bfloat16):
    """Pad hidden/output dims to 128 lanes and cast weights once, outside the jit.

    Zero padding keeps the math exact: ReLU(0)=0 in padded hidden lanes, and zero rows
    of w2 contribute nothing; padded output lanes are never written back.
    """
    in_size, hid = w1.shape
    out_size = w2.shape[1]
    h_pad = _round_up(hid, LANE)       # 50 -> 128
    o_pad = _round_up(out_size, LANE)  # 2  -> 128
    f32 = jnp.float32
    w1p = jnp.pad(w1.astype(compute_dtype), ((0, 0), (0, h_pad - hid)))
    b1p = jnp.pad(b1.astype(f32).reshape(1, -1), ((0, 0), (0, h_pad - hid)))
    w2p = jnp.pad(w2.astype(compute_dtype), ((0, h_pad - hid), (0, o_pad - out_size)))
    b2p = jnp.pad(b2.astype(f32).reshape(1, -1), ((0, 0), (0, o_pad - out_size)))
    return w1p, b1p, w2p, b2p, out_size


@functools.partial(jax.jit, static_argnames=("out_size", "block_b"))
def mlp_forward(x, w1p, b1p, w2p, b2p, *, out_size, block_b=2048):
    """x: (B, in_size) f32 (or bf16); params from prepare_params."""
    B, in_size = x.shape
    h_pad = w1p.shape[1]
    o_pad = w2p.shape[1]

    # Batch tiling: large tiles amortize per-step overhead; no batch padding — Pallas
    # clips the ragged last block's writeback.
    if B > block_b:
        b_tile = block_b
    else:
        b_tile = B
        # v7x megacore: make the grid at least 2 steps when batch is big enough to matter.
        if B >= 4 * ROW_ALIGN:
            b_tile = _round_up(pl.cdiv(B, 2), ROW_ALIGN)
    grid = (pl.cdiv(B, b_tile),)

    return pl.pallas_call(
        _mlp_kernel,
        out_shape=jax.ShapeDtypeStruct((B, out_size), jnp.float32),
        grid=grid,
        in_specs=[
            pl.BlockSpec((b_tile, in_size), lambda i: (i, 0)),   # streamed batch tile
            pl.BlockSpec((in_size, h_pad), lambda i: (0, 0)),    # VMEM-resident weights
            pl.BlockSpec((1, h_pad), lambda i: (0, 0)),
            pl.BlockSpec((h_pad, o_pad), lambda i: (0, 0)),
            pl.BlockSpec((1, o_pad), lambda i: (0, 0)),
        ],
        # Full (true) last dim in the output block -> lane-narrow but legal, and only
        # the real out_size columns ever reach HBM.
        out_specs=pl.BlockSpec((b_tile, out_size), lambda i: (i, 0)),
        compiler_params=pltpu.CompilerParams(
            dimension_semantics=("parallel",)),
    )(x, w1p, b1p, w2p, b2p)


def init_params(key, input_size, hidden_size, output_size):
    # Deterministic init mimicking torch.nn.Linear (uniform +/- 1/sqrt(fan_in)).
    k1, k2, k3, k4 = jax.random.split(key, 4)
    lim1 = 1.0 / jnp.sqrt(input_size)
    lim2 = 1.0 / jnp.sqrt(hidden_size)
    w1 = jax.random.uniform(k1, (input_size, hidden_size), jnp.float32, -lim1, lim1)
    b1 = jax.random.uniform(k2, (1, hidden_size), jnp.float32, -lim1, lim1)
    w2 = jax.random.uniform(k3, (hidden_size, output_size), jnp.float32, -lim2, lim2)
    b2 = jax.random.uniform(k4, (1, output_size), jnp.float32, -lim2, lim2)
    return w1, b1, w2, b2


if __name__ == "__main__":
    # Module hyperparams: hidden is fixed to 50 in __init__; small test shapes.
    batch, input_size, hidden_size, output_size = 8, 32, 50, 2

    key = jax.random.PRNGKey(0)
    kx, kp = jax.random.split(key)
    x = jax.random.normal(kx, (batch, input_size), jnp.float32)
    w1, b1, w2, b2 = init_params(kp, input_size, hidden_size, output_size)

    # Pad / cast the (static) parameters once, outside the forward call.
    w1p, b1p, w2p, b2p, out_size = prepare_params(w1, b1, w2, b2)

    out = mlp_forward(x, w1p, b1p, w2p, b2p, out_size=out_size)
    out = jax.block_until_ready(out)

    # Reference check in plain JAX (same math as the PyTorch forward, f32).
    # Tolerance relaxed because the kernel uses bf16 MXU inputs + EUP approx reciprocal.
    ref = jax.nn.sigmoid(jnp.maximum(x @ w1 + b1, 0.0) @ w2 + b2)
    assert out.shape == (batch, output_size)
    assert jnp.allclose(out, ref, atol=2e-2), "mismatch vs reference"

    # TODO(synk): train_model/evaluate_model (SGD+momentum, BCELoss, cosine LR schedule,
    # accuracy counting) are host-side training utilities, not part of the forward kernel.
    print("KERNEL_OK")
</pallas_src>

<mosaic_0001>
module attributes {stable_mosaic.version = 11 : i64} {
  func.func @_mlp_kernel(%arg0: i32, %arg1: memref<8x32xf32, #tpu.memory_space<vmem>>, %arg2: memref<32x128xbf16, #tpu.memory_space<vmem>>, %arg3: memref<1x128xf32, #tpu.memory_space<vmem>>, %arg4: memref<128x128xbf16, #tpu.memory_space<vmem>>, %arg5: memref<1x128xf32, #tpu.memory_space<vmem>>, %arg6: memref<8x2xf32, #tpu.memory_space<vmem>>) attributes {dimension_semantics = [#tpu.dimension_semantics<parallel>], iteration_bounds = array<i64: 1>, scalar_prefetch = 0 : i64, scratch_operands = 0 : i64, tpu.core_type = #tpu.core_type<tc>, window_params = [{transform_indices = @transform_0, window_bounds = array<i64: 8, 32>}, {pipeline_mode = #tpu.pipeline_mode<synchronous>, transform_indices = @transform_1, window_bounds = array<i64: 32, 128>}, {pipeline_mode = #tpu.pipeline_mode<synchronous>, transform_indices = @transform_2, window_bounds = array<i64: 1, 128>}, {pipeline_mode = #tpu.pipeline_mode<synchronous>, transform_indices = @transform_3, window_bounds = array<i64: 128, 128>}, {pipeline_mode = #tpu.pipeline_mode<synchronous>, transform_indices = @transform_4, window_bounds = array<i64: 1, 128>}, {transform_indices = @transform_5, window_bounds = array<i64: 8, 2>}]} {
    %c0 = arith.constant 0 : index
    %c0_0 = arith.constant 0 : index
    %0 = vector.load %arg1[%c0, %c0_0] : memref<8x32xf32, #tpu.memory_space<vmem>>, vector<8x32xf32>
    %1 = arith.truncf %0 : vector<8x32xf32> to vector<8x32xbf16>
    %c0_1 = arith.constant 0 : index
    %c0_2 = arith.constant 0 : index
    %2 = vector.load %arg2[%c0_1, %c0_2] : memref<32x128xbf16, #tpu.memory_space<vmem>>, vector<32x128xbf16>
    %cst = arith.constant dense<0.000000e+00> : vector<8x128xf32>
    %3 = tpu.matmul %1, %2, %cst {dimension_numbers = #tpu.dot_dimension_numbers<[1], [0], [0], [1], [0, 0, 1, 1], [], []>} : vector<8x32xbf16>, vector<32x128xbf16>, vector<8x128xf32> -> vector<8x128xf32>
    %c0_3 = arith.constant 0 : index
    %c0_4 = arith.constant 0 : index
    %4 = vector.load %arg3[%c0_3, %c0_4] : memref<1x128xf32, #tpu.memory_space<vmem>>, vector<1x128xf32>
    %5 = vector.broadcast %4 : vector<1x128xf32> to vector<8x128xf32>
    %6 = arith.addf %3, %5 : vector<8x128xf32>
    %cst_5 = arith.constant 0.000000e+00 : f32
    %7 = vector.broadcast %cst_5 : f32 to vector<8x128xf32>
    %8 = arith.maximumf %6, %7 : vector<8x128xf32>
    %9 = arith.truncf %8 : vector<8x128xf32> to vector<8x128xbf16>
    %c0_6 = arith.constant 0 : index
    %c0_7 = arith.constant 0 : index
    %10 = vector.load %arg4[%c0_6, %c0_7] : memref<128x128xbf16, #tpu.memory_space<vmem>>, vector<128x128xbf16>
    %cst_8 = arith.constant dense<0.000000e+00> : vector<8x128xf32>
    %11 = tpu.matmul %9, %10, %cst_8 {dimension_numbers = #tpu.dot_dimension_numbers<[1], [0], [0], [1], [0, 0, 1, 1], [], []>} : vector<8x128xbf16>, vector<128x128xbf16>, vector<8x128xf32> -> vector<8x128xf32>
    %c0_9 = arith.constant 0 : index
    %c0_10 = arith.constant 0 : index
    %12 = vector.load %arg5[%c0_9, %c0_10] : memref<1x128xf32, #tpu.memory_space<vmem>>, vector<1x128xf32>
    %13 = vector.broadcast %12 : vector<1x128xf32> to vector<8x128xf32>
    %14 = arith.addf %11, %13 : vector<8x128xf32>
    %cst_11 = arith.constant 0.000000e+00 : f32
    %15 = vector.broadcast %cst_11 : f32 to vector<8x128xf32>
    %16 = arith.subf %15, %14 : vector<8x128xf32>
    %17 = math.exp %16 : vector<8x128xf32>
    %cst_12 = arith.constant 1.000000e+00 : f32
    %18 = vector.broadcast %cst_12 : f32 to vector<8x128xf32>
    %19 = arith.addf %18, %17 : vector<8x128xf32>
    %20 = tpu.reciprocal %19 {approx = true} : vector<8x128xf32> -> vector<8x128xf32>
    %21 = vector.extract_strided_slice %20 {offsets = [0, 0], sizes = [8, 2], strides = [1, 1]} : vector<8x128xf32> to vector<8x2xf32>
    %c0_13 = arith.constant 0 : index
    %c0_14 = arith.constant 0 : index
    %22 = vector.load %arg6[%c0_13, %c0_14] : memref<8x2xf32, #tpu.memory_space<vmem>>, vector<8x2xf32>
    tpu.vector_store %arg6[%c0_13, %c0_14], %21 {strides = array<i32>} : memref<8x2xf32, #tpu.memory_space<vmem>>, vector<8x2xf32>,
    return
  }
  func.func @transform_0(%arg0: i32) -> (i32, i32) {
    %c0_i32 = arith.constant 0 : i32
    %c0_i32_0 = arith.constant 0 : i32
    return %arg0, %c0_i32 : i32, i32
  }
  func.func @transform_1(%arg0: i32) -> (i32, i32) {
    %c0_i32 = arith.constant 0 : i32
    %c0_i32_0 = arith.constant 0 : i32
    %c0_i32_1 = arith.constant 0 : i32
    return %c0_i32, %c0_i32_0 : i32, i32
  }
  func.func @transform_2(%arg0: i32) -> (i32, i32) {
    %c0_i32 = arith.constant 0 : i32
    %c0_i32_0 = arith.constant 0 : i32
    %c0_i32_1 = arith.constant 0 : i32
    return %c0_i32, %c0_i32_0 : i32, i32
  }
  func.func @transform_3(%arg0: i32) -> (i32, i32) {
    %c0_i32 = arith.constant 0 : i32
    %c0_i32_0 = arith.constant 0 : i32
    %c0_i32_1 = arith.constant 0 : i32
    return %c0_i32, %c0_i32_0 : i32, i32
  }
  func.func @transform_4(%arg0: i32) -> (i32, i32) {
    %c0_i32 = arith.constant 0 : i32
    %c0_i32_0 = arith.constant 0 : i32
    %c0_i32_1 = arith.constant 0 : i32
    return %c0_i32, %c0_i32_0 : i32, i32
  }
  func.func @transform_5(%arg0: i32) -> (i32, i32) {
    %c0_i32 = arith.constant 0 : i32
    %c0_i32_0 = arith.constant 0 : i32
    return %arg0, %c0_i32 : i32, i32
  }
}

</mosaic_0001>

<bundles_post_ra>
// kernel: mlp_forward.1
= control target key start
LH: loop header
LB: loop body
LE: loop exit
PB: predicated region body
PF: predicated region fallthrough
CT: control target
= control target key end

     0   :  { %10 = vsyncpa [#allocation3], 0  ;;  %s487_s0 = inlined_call_operand.hbm [shape: f32[8,32], index: 0, kind: input, shape index: {}]   ;;  %s488_s1 = inlined_call_operand.hbm [shape: bf16[32,128], index: 1, kind: input, shape index: {}]   ;;  %s489_s2 = inlined_call_operand.vmem [shape: f32[1,128], index: 2, kind: input, shape index: {}]   ;;  %s490_s3 = inlined_call_operand.hbm [shape: bf16[128,128], index: 3, kind: input, shape index: {}]   ;;  %s491_s4 = inlined_call_operand.vmem [shape: f32[1,128], index: 4, kind: input, shape index: {}]   ;;  %s492_s5 = inlined_call_operand.vmem [shape: f32[8,2], index: 5, kind: output, shape index: {}]  }
   0x1   :  { %11 = vsyncpa [#allocation5], 0  ;;  %s399_s18 = smov [#allocation4]   ;;  %s329_s22 = scalar_lea.hbm %s488_s1, 256 }
   0x2   :  { %s27_s19 = sshll.u32 %s399_s18, 4  ;;  %p330_p0 = scmp.ne.s32.totalorder %s488_s1, %s329_s22  ;;  %s28_s19 = int_to_ptr.vmem [resolvable:$true] %s27_s19 }
   0x3   :  { %p333_p1 = scmp.lt.u32.totalorder %s329_s22, %s488_s1 }
   0x5   :  { %p335_p2 = pnand %p333_p1, %p330_p0 }
   0x7   :  { %338 = shalt.err (!%p335_p2)
}
   0x8   :  { %s339_s27 = scalar_lea.vmem %s28_s19, 256  ;;  %p344_p4 = scmp.lt.s32.totalorder %s28_s19, %s28_s19 }
   0x9   :  { %p340_p3 = scmp.ne.s32.totalorder %s28_s19, %s339_s27  ;;  %p345_p5 = scmp.lt.s32.totalorder %s339_s27, %s339_s27 }
   0xb   :  { %p346_p6 = por %p345_p5, %p344_p4 }
   0xd   :  { %p347_p7 = pnand %p346_p6, %p340_p3 }
   0xf   :  { %350 = shalt.err (!%p347_p7)
}
  0x10   :  { %s400_s28 = smov 64   ;;  %s401_s29 = smov 4  }
  0x11   :  { %33 = dma.hbm_to_vmem [thread:$0]  %s488_s1, 256, %s28_s19, [#allocation5], %s400_s28, %s400_s28, %s401_s29  }
  0x12   :  { %s402_s7 = smov [#allocation2]   ;;  %s403_s9 = smov [#allocation6]  }
  0x13   :  { %s18_s8 = sshll.u32 %s402_s7, 4  ;;  %s41_s10 = sshll.u32 %s403_s9, 4  ;;  %s19_s8 = int_to_ptr.vmem [resolvable:$true] %s18_s8  ;;  %s42_s10 = int_to_ptr.vmem [resolvable:$true] %s41_s10 }
  0x14   :  { %s351_s13 = scalar_lea.hbm %s487_s0, 128 }
  0x15   :  { %p352_p8 = scmp.ne.s32.totalorder %s487_s0, %s351_s13  ;;  %p355_p9 = scmp.lt.u32.totalorder %s351_s13, %s487_s0 }
  0x17   :  { %p357_p10 = pnand %p355_p9, %p352_p8 }
  0x19   :  { %360 = shalt.err (!%p357_p10)
}
  0x1a   :  { %s361_s1 = scalar_lea.vmem %s19_s8, 128  ;;  %p366_p12 = scmp.lt.s32.totalorder %s19_s8, %s19_s8 }
  0x1b   :  { %p362_p11 = scmp.ne.s32.totalorder %s19_s8, %s361_s1  ;;  %p367_p13 = scmp.lt.s32.totalorder %s361_s1, %s361_s1 }
  0x1d   :  { %p368_p0 = por %p367_p13, %p366_p12 }
  0x1f   :  { %p369_p1 = pnand %p368_p0, %p362_p11 }
  0x21   :  { %372 = shalt.err (!%p369_p1)
}
  0x22   :  { %21 = dma.hbm_to_vmem [thread:$0]  %s487_s0, 128, %s19_s8, [#allocation3]  }
  0x23   :  { %s373_s22 = scalar_lea.hbm %s490_s3, 1024 }
  0x24   :  { %p374_p2 = scmp.ne.s32.totalorder %s490_s3, %s373_s22  ;;  %p377_p3 = scmp.lt.u32.totalorder %s373_s22, %s490_s3 }
  0x26   :  { %p379_p4 = pnand %p377_p3, %p374_p2 }
  0x28   :  { %382 = shalt.err (!%p379_p4)
}
  0x29   :  { %s383_s27 = scalar_lea.vmem %s42_s10, 1024  ;;  %p388_p6 = scmp.lt.s32.totalorder %s42_s10, %s42_s10 }
  0x2a   :  { %p384_p5 = scmp.ne.s32.totalorder %s42_s10, %s383_s27  ;;  %p389_p7 = scmp.lt.s32.totalorder %s383_s27, %s383_s27 }
  0x2c   :  { %p390_p8 = por %p389_p7, %p388_p6 }
  0x2e   :  { %p391_p9 = pnand %p390_p8, %p384_p5 }
  0x30   :  { %394 = shalt.err (!%p391_p9)
}
  0x31   :  { %47 = dma.hbm_to_vmem [thread:$0]  %s490_s3, 1024, %s42_s10, [#allocation5], %s400_s28, %s400_s28, %s401_s29  }
  0x32   :  { %395 = dma.done.wait [#allocation3], 128  }
  0x33   :  { %396 = vsyncadd [#allocation3], 4294967168 }
  0x34   :  { %397 = dma.done.wait [#allocation5], 1280  }
  0x35   :  { %398 = vsyncadd [#allocation5], 4294966016  ;;  %v404_v0 = vmov 0.0   ;;  %vm405_vm0 = vmmov 0   ;;  %v315_v1 = vld [vmem:[#allocation4] sm:$0xff]   ;;  %v316_v2 = vld [vmem:[#allocation4 + $0x8] sm:$0xff]  }
  0x36   :  { %280 = vmatprep.subr.bf16.mxu0 %v404_v0  ;;  %284 = vmatprep.mubr.msk.bf16.mxu0 %vm405_vm0, %v404_v0  ;;  %v60_v3 = vld [vmem:[#allocation2] sm:$0xff]  ;;  %v317_v4 = vld [vmem:[#allocation6] sm:$0xff]   ;;  %vm85_vm1 = vcmask 261120   ;;  %v319_v7 = vld [vmem:[#allocation6 + $0x10] sm:$0xff]   ;;  %vm247_vm2 = vcmask 15360  }
  0x37   :  { %288 = vmatprep.subr.bf16.mxu1 %v404_v0  ;;  %304 = vmatprep.mubr.msk.bf16.mxu1 %vm405_vm0, %v404_v0  ;;  %v61_v5 = vpack.c.bf16 %v60_v3, %v60_v3  ;;  %v318_v6 = vld [vmem:[#allocation6 + $0x8] sm:$0xff]   ;;  %v320_v8 = vld [vmem:[#allocation6 + $0x18] sm:$0xff]   ;;  %v321_v9 = vld [vmem:[#allocation6 + $0x20] sm:$0xff]  }
  0x38   :  { %281 = vmatpush3.bf16.msra.mxu0 %v315_v1  ;;  %289 = vmatpush3.bf16.msra.mxu1 %v317_v4  ;;  %v322_v10 = vld [vmem:[#allocation6 + $0x28] sm:$0xff]   ;;  %v323_v11 = vld [vmem:[#allocation6 + $0x30] sm:$0xff]   ;;  %v324_v12 = vld [vmem:[#allocation6 + $0x38] sm:$0xff]  }
  0x39   :  { %282 = vmatprep.subr.bf16.mxu0 %v404_v0  ;;  %290 = vmatprep.subr.bf16.mxu1 %v404_v0  ;;  %v255_v13 = vld [vmem:[%s489_s2] ss:$0 sm:$0xff] }
  0x3a   :  { %v259_v21 = vld [vmem:[%s491_s4] ss:$0 sm:$0xff] }
  0x3c   :  { %283 = vmatpush3.bf16.msra.mxu0 %v316_v2  ;;  %291 = vmatpush3.bf16.msra.mxu1 %v318_v6 }
  0x3d   :  { %292 = vmatprep.subr.bf16.mxu1 %v404_v0 }
  0x3f   :  { %285 = vmatmul.mubr.msk.bf16.vlgmr.msra.gmra.mrb[0].mxu0 %vm85_vm1, %v61_v5 }
  0x40   :  { %293 = vmatpush3.bf16.msra.mxu1 %v319_v7 }
  0x41   :  { %294 = vmatprep.subr.bf16.mxu1 %v404_v0 }
  0x44   :  { %295 = vmatpush3.bf16.msra.mxu1 %v320_v8 }
  0x45   :  { %296 = vmatprep.subr.bf16.mxu1 %v404_v0 }
  0x48   :  { %297 = vmatpush3.bf16.msra.mxu1 %v321_v9 }
  0x49   :  { %298 = vmatprep.subr.bf16.mxu1 %v404_v0 }
  0x4c   :  { %299 = vmatpush3.bf16.msra.mxu1 %v322_v10 }
  0x4d   :  { %300 = vmatprep.subr.bf16.mxu1 %v404_v0 }
  0x50   :  { %301 = vmatpush3.bf16.msra.mxu1 %v323_v11 }
  0x51   :  { %302 = vmatprep.subr.bf16.mxu1 %v404_v0 }
  0x54   :  { %303 = vmatpush3.bf16.msra.mxu1 %v324_v12 }
 0x112   :  { %v123_v14 = vpop.f32.mrb[0].mxu0 }
 0x113   :  { %v124_v15 = vadd.f32 %v255_v13, %v123_v14  ;;  %v286_v16 = vpop.f32.mrb[1].mxu0 }
 0x114   :  { %v126_v17 = vpop.f32.mrb[2].mxu0 }
 0x115   :  { %v129_v18 = vmax.f32 %v124_v15, 0.0  ;;  %v287_v19 = vpop.f32.mrb[3].mxu0 }
 0x117   :  { %v130_v20 = vpack.c.bf16 %v129_v18, %v129_v18 }
 0x119   :  { %305 = vmatmul.mubr.bf16.vlgmr.msra.gmra.mrb[0].mxu1 %v130_v20 }
 0x1ec   :  { %v236_v22 = vpop.f32.mrb[0].mxu1 }
 0x1ed   :  { %v237_v23 = vadd.f32 %v259_v21, %v236_v22  ;;  %v306_v24 = vpop.f32.mrb[1].mxu1 }
 0x1ee   :  { %v239_v25 = vpop.f32.mrb[2].mxu1 }
 0x1ef   :  { %v242_v26 = vsub.f32 0.0, %v237_v23  ;;  %v307_v27 = vpop.f32.mrb[3].mxu1 }
 0x1f1   :  { %v243_v28 = vmul.f32 1.442695, %v242_v26 }
 0x1f3   :  { %325 = vpow2.f32 %v243_v28 }
 0x1fd   :  { %v326_v29 = vpop.eup %325 }
 0x1fe   :  { %v245_v30 = vadd.f32 1.0, %v326_v29 }
 0x200   :  { %327 = vrcp.f32 %v245_v30 }
 0x20a   :  { %v328_v31 = vpop.eup %327 }
 0x20b   :  { %248 = vst.msk [vmem:[%s492_s5] sm:$0xff] %vm247_vm2, %v328_v31 }
 0x20c   :  { %253 = vsyncpa [#allocation3], 1 }
 0x20d   :  { %254 = vsyncpa [#allocation5], 1 }

</bundles_post_ra>
